<compile_context>
chip_gen: v5e
topology: v5e:2x2
jax: 0.10.0
libtpu: 0.0.40
codegen_flags: <defaults>
</compile_context>

<pallas_src>
import jax
import jax.numpy as jnp
from jax.experimental import pallas as pl
from jax.experimental.pallas import tpu as pltpu

_LANES = 512          # lane-dense tile width: large multiple of 128 -> unmasked vst
_MAX_BLOCK_ROWS = 256 # 256 x 512 x f32 = 512 KiB per buffer; ~2 MiB with double-buffering
_ROW_PAD = 32         # sublane multiple covering f32(8) / bf16(16) / int8(32) tilings


def _cast_kernel(x_ref, o_ref):
    # Elementwise cast to float32 (equivalent of .type(torch.float)).
    o_ref[...] = x_ref[...].astype(jnp.float32)


def _round_up(x, m):
    return ((x + m - 1) // m) * m


def _tiled_cast_f32(x):
    """Cast an arbitrary-shaped/dtyped array to float32 via a tiled Pallas kernel.

    Returns a flat float32 array with x.size elements (caller reshapes).
    """
    flat = x.reshape(-1)
    total = flat.shape[0]

    # Number of 512-wide rows required to hold all elements.
    rows_needed = max(1, pl.cdiv(total, _LANES))

    # Pick block rows and pad row count to a multiple of the block, so every
    # grid step is a full, unmasked (block_rows, _LANES) tile.
    if rows_needed <= _MAX_BLOCK_ROWS:
        block_rows = _round_up(rows_needed, _ROW_PAD)
        rows = block_rows
    else:
        block_rows = _MAX_BLOCK_ROWS
        rows = _round_up(rows_needed, block_rows)

    padded_total = rows * _LANES
    if padded_total != total:
        flat = jnp.pad(flat, (0, padded_total - total))
    slab = flat.reshape(rows, _LANES)

    grid = (rows // block_rows,)

    out = pl.pallas_call(
        _cast_kernel,
        out_shape=jax.ShapeDtypeStruct((rows, _LANES), jnp.float32),
        grid_spec=pltpu.PrefetchScalarGridSpec(
            num_scalar_prefetch=0,
            grid=grid,
            in_specs=[pl.BlockSpec((block_rows, _LANES), lambda i: (i, 0))],
            out_specs=pl.BlockSpec((block_rows, _LANES), lambda i: (i, 0)),
        ),
        compiler_params=pltpu.CompilerParams(
            dimension_semantics=("parallel",),
        ),
    )(slab)

    return out.reshape(-1)[:total]


def at_base_forward(intensity, angle):
    """Mirror AtBase.forward.

    intensity: shape (Bi, ...), any dtype
    angle:     shape (Ba, ...), any dtype
    Returns (intensity_f32, angle_f32) of shapes (Bi, Ni, 1) / (Ba, Na, 1), float32.
    (The PyTorch forward returns None; we return the computed intermediates.)
    """
    bi = intensity.shape[0]
    ba = angle.shape[0]
    int_f32 = _tiled_cast_f32(intensity).reshape(bi, -1, 1)
    ang_f32 = _tiled_cast_f32(angle).reshape(ba, -1, 1)
    return int_f32, ang_f32


# TODO(synk): the reference forward body ends after the two casts (returns
# None); no further layers are applied in the provided module code.


if __name__ == "__main__":
    key = jax.random.PRNGKey(0)
    k1, k2, k3, k4 = jax.random.split(key, 4)

    # --- Primary small test, consistent with the forward's .view(B, -1, 1) ---
    intensity = jax.random.randint(k1, (2, 16, 16), minval=0, maxval=255,
                                   dtype=jnp.int32)
    angle = jax.random.normal(k2, (2, 16, 16), dtype=jnp.float32).astype(
        jnp.bfloat16)

    int_out, ang_out = at_base_forward(intensity, angle)
    jax.block_until_ready((int_out, ang_out))

    ref_int = intensity.reshape(2, -1, 1).astype(jnp.float32)
    ref_ang = angle.reshape(2, -1, 1).astype(jnp.float32)
    assert int_out.shape == (2, 256, 1) and int_out.dtype == jnp.float32
    assert ang_out.shape == (2, 256, 1) and ang_out.dtype == jnp.float32
    assert jnp.allclose(int_out, ref_int)
    assert jnp.allclose(ang_out, ref_ang)

    # --- Secondary test: ragged sizes, different batch sizes per input, and a
    #     multi-tile grid (exercises padding path). ---
    intensity2 = jax.random.normal(k3, (4, 512, 160), dtype=jnp.float32)
    angle2 = jax.random.normal(k4, (2, 37, 11), dtype=jnp.float32).astype(
        jnp.bfloat16)

    int_out2, ang_out2 = at_base_forward(intensity2, angle2)
    jax.block_until_ready((int_out2, ang_out2))

    ref_int2 = intensity2.reshape(4, -1, 1).astype(jnp.float32)
    ref_ang2 = angle2.reshape(2, -1, 1).astype(jnp.float32)
    assert int_out2.shape == ref_int2.shape and jnp.allclose(int_out2, ref_int2)
    assert ang_out2.shape == ref_ang2.shape and jnp.allclose(ang_out2, ref_ang2)

    print("KERNEL_OK")
</pallas_src>

<mosaic_0001>
module attributes {stable_mosaic.version = 11 : i64} {
  func.func @_cast_kernel(%arg0: i32, %arg1: memref<32x512xi32, #tpu.memory_space<vmem>>, %arg2: memref<32x512xf32, #tpu.memory_space<vmem>>) attributes {dimension_semantics = [#tpu.dimension_semantics<parallel>], iteration_bounds = array<i64: 1>, scalar_prefetch = 0 : i64, scratch_operands = 0 : i64, tpu.core_type = #tpu.core_type<tc>, window_params = [{transform_indices = @transform_0, window_bounds = array<i64: 32, 512>}, {transform_indices = @transform_1, window_bounds = array<i64: 32, 512>}]} {
    %c0 = arith.constant 0 : index
    %c0_0 = arith.constant 0 : index
    %0 = vector.load %arg1[%c0, %c0_0] : memref<32x512xi32, #tpu.memory_space<vmem>>, vector<32x512xi32>
    %1 = arith.sitofp %0 : vector<32x512xi32> to vector<32x512xf32>
    %c0_1 = arith.constant 0 : index
    %c0_2 = arith.constant 0 : index
    %2 = vector.load %arg2[%c0_1, %c0_2] : memref<32x512xf32, #tpu.memory_space<vmem>>, vector<32x512xf32>
    tpu.vector_store %arg2[%c0_1, %c0_2], %1 {strides = array<i32>} : memref<32x512xf32, #tpu.memory_space<vmem>>, vector<32x512xf32>,
    return
  }
  func.func @transform_0(%arg0: i32) -> (i32, i32) {
    %c0_i32 = arith.constant 0 : i32
    %c0_i32_0 = arith.constant 0 : i32
    return %arg0, %c0_i32 : i32, i32
  }
  func.func @transform_1(%arg0: i32) -> (i32, i32) {
    %c0_i32 = arith.constant 0 : i32
    %c0_i32_0 = arith.constant 0 : i32
    return %arg0, %c0_i32 : i32, i32
  }
}

</mosaic_0001>

<bundles_post_ra>
// kernel: tpu_custom_call.1
= control target key start
LH: loop header
LB: loop body
LE: loop exit
PB: predicated region body
PF: predicated region fallthrough
CT: control target
= control target key end

     0   :  { %6 = vsyncpa [#allocation3], 0  ;;  %s174_s0 = inlined_call_operand.hbm [shape: s32[32,512], index: 0, kind: input, shape index: {}]   ;;  %s175_s1 = inlined_call_operand.hbm [shape: f32[32,512], index: 1, kind: output, shape index: {}]  }
   0x1   :  { %7 = vsyncpa [#allocation4], 0  ;;  %s12_s8 = sshll.u32 %s174_s0, 4  ;;  %s148_s9 = smov [#allocation2]   ;;  %s13_s8 = int_to_ptr.hbm [resolvable:$true] %s12_s8 }
   0x2   :  { %s14_s10 = sshll.u32 %s148_s9, 4  ;;  %s149_s11 = smov 512   ;;  %s15_s10 = int_to_ptr.vmem [resolvable:$true] %s14_s10 }
   0x3   :  { %s150_s12 = smov 32  }
   0x4   :  { %20 = dma.hbm_to_vmem [thread:$0]  %s13_s8, 2048, %s15_s10, [#allocation3], %s149_s11, %s149_s11, %s150_s12  }
   0x5   :  { %144 = dma.done.wait [#allocation3], 2048  }
   0x6   :  { %145 = vsyncadd [#allocation3], 4294965248  ;;  %v25_v0 = vld [vmem:[#allocation2] sm:$0xff]  ;;  %v26_v1 = vld [vmem:[#allocation2 + $0x8] sm:$0xff]  ;;  %s151_s0 = smov [#allocation5]   ;;  %s79_s16 = sshll.u32 %s175_s1, 4  ;;  %s80_s16 = int_to_ptr.hbm [resolvable:$true] %s79_s16 }
   0x7   :  { %v27_v2 = vld [vmem:[#allocation2 + $0x10] sm:$0xff]  ;;  %v41_v3 = vcvt.s32.f32 %v25_v0  ;;  %v42_v4 = vcvt.s32.f32 %v26_v1  ;;  %v28_v6 = vld [vmem:[#allocation2 + $0x18] sm:$0xff]  ;;  %v29_v7 = vld [vmem:[#allocation2 + $0x20] sm:$0xff]  ;;  %s77_s13 = sshll.u32 %s151_s0, 4  ;;  %s78_s13 = int_to_ptr.vmem [resolvable:$true] %s77_s13 }
   0x8   :  { %v43_v5 = vcvt.s32.f32 %v27_v2  ;;  %v30_v8 = vld [vmem:[#allocation2 + $0x28] sm:$0xff]  ;;  %v44_v9 = vcvt.s32.f32 %v28_v6  ;;  %v31_v10 = vld [vmem:[#allocation2 + $0x30] sm:$0xff]  ;;  %v45_v11 = vcvt.s32.f32 %v29_v7  ;;  %v32_v12 = vld [vmem:[#allocation2 + $0x38] sm:$0xff] }
   0x9   :  { %57 = vst [vmem:[#allocation5] sm:$0xff] %v41_v3  ;;  %v46_v13 = vcvt.s32.f32 %v30_v8  ;;  %v33_v14 = vld [vmem:[#allocation2 + $0x40] sm:$0xff]  ;;  %v47_v15 = vcvt.s32.f32 %v31_v10  ;;  %v34_v16 = vld [vmem:[#allocation2 + $0x48] sm:$0xff]  ;;  %v48_v17 = vcvt.s32.f32 %v32_v12  ;;  %v35_v18 = vld [vmem:[#allocation2 + $0x50] sm:$0xff] }
   0xa   :  { %58 = vst [vmem:[#allocation5 + $0x8] sm:$0xff] %v42_v4  ;;  %v49_v19 = vcvt.s32.f32 %v33_v14  ;;  %v36_v20 = vld [vmem:[#allocation2 + $0x58] sm:$0xff]  ;;  %v50_v21 = vcvt.s32.f32 %v34_v16  ;;  %v37_v22 = vld [vmem:[#allocation2 + $0x60] sm:$0xff]  ;;  %v51_v23 = vcvt.s32.f32 %v35_v18  ;;  %v38_v24 = vld [vmem:[#allocation2 + $0x68] sm:$0xff] }
   0xb   :  { %59 = vst [vmem:[#allocation5 + $0x10] sm:$0xff] %v43_v5  ;;  %v52_v25 = vcvt.s32.f32 %v36_v20  ;;  %v39_v26 = vld [vmem:[#allocation2 + $0x70] sm:$0xff]  ;;  %v53_v27 = vcvt.s32.f32 %v37_v22  ;;  %v40_v28 = vld [vmem:[#allocation2 + $0x78] sm:$0xff]  ;;  %v54_v29 = vcvt.s32.f32 %v38_v24 }
   0xc   :  { %60 = vst [vmem:[#allocation5 + $0x18] sm:$0xff] %v44_v9  ;;  %v55_v30 = vcvt.s32.f32 %v39_v26  ;;  %v56_v31 = vcvt.s32.f32 %v40_v28 }
   0xd   :  { %61 = vst [vmem:[#allocation5 + $0x20] sm:$0xff] %v45_v11 }
   0xe   :  { %62 = vst [vmem:[#allocation5 + $0x28] sm:$0xff] %v46_v13 }
   0xf   :  { %63 = vst [vmem:[#allocation5 + $0x30] sm:$0xff] %v47_v15 }
  0x10   :  { %64 = vst [vmem:[#allocation5 + $0x38] sm:$0xff] %v48_v17 }
  0x11   :  { %65 = vst [vmem:[#allocation5 + $0x40] sm:$0xff] %v49_v19 }
  0x12   :  { %66 = vst [vmem:[#allocation5 + $0x48] sm:$0xff] %v50_v21 }
  0x13   :  { %67 = vst [vmem:[#allocation5 + $0x50] sm:$0xff] %v51_v23 }
  0x14   :  { %68 = vst [vmem:[#allocation5 + $0x58] sm:$0xff] %v52_v25 }
  0x15   :  { %69 = vst [vmem:[#allocation5 + $0x60] sm:$0xff] %v53_v27 }
  0x16   :  { %70 = vst [vmem:[#allocation5 + $0x68] sm:$0xff] %v54_v29 }
  0x17   :  { %71 = vst [vmem:[#allocation5 + $0x70] sm:$0xff] %v55_v30 }
  0x18   :  { %72 = vst [vmem:[#allocation5 + $0x78] sm:$0xff] %v56_v31 }
  0x19   :  { %85 = dma.vmem_to_hbm [thread:$0]  %s78_s13, 2048, %s80_s16, [#allocation4], %s149_s11, %s149_s11, %s150_s12  }
  0x1a   :  { %146 = dma.done.wait [#allocation4], 2048  }
  0x1b   :  { %147 = vsyncadd [#allocation4], 4294965248 }
  0x1c   :  { %90 = vsyncpa [#allocation3], 1 }
  0x1d   :  { %91 = vsyncpa [#allocation4], 1 }

</bundles_post_ra>
